<compile_context>
chip_gen: v6e
topology: v6e:2x2x1
jax: 0.10.0
libtpu: 0.0.40
codegen_flags: <defaults>
</compile_context>

<pallas_src>
import functools
import math

import jax
import jax.numpy as jnp
from jax.experimental import pallas as pl
from jax.experimental.pallas import tpu as pltpu

# ArcMarginProduct hyper-parameters (module defaults: s=31.0, m=0.5, easy_margin=False)
_S = 31.0
_M = 0.5
_COS_M = math.cos(_M)
_SIN_M = math.sin(_M)
_TH = math.cos(math.pi - _M)
_MM = math.sin(math.pi - _M)

_LANE = 128
_SUBLANE = 8


def _round_up(x, m):
    return ((x + m - 1) // m) * m


def _physical_vmem_bytes():
    """Per-core physical VMEM; conservative fallback if the query is unavailable."""
    try:
        info = pltpu.get_tpu_info()
        v = int(getattr(info, "vmem_capacity_bytes", 0))
        if v > 0:
            return v
    except Exception:
        pass
    return 64 * 1024 * 1024  # v7x-sized fallback: safe on every generation


def _vmem_budgets():
    phys = _physical_vmem_bytes()
    per_buf = max(phys // 16, 2 * 1024 * 1024)        # per double-buffered input block
    vmem_limit = int(min(phys // 2, 4 * per_buf + (16 << 20)))
    return per_buf, vmem_limit


def _pick_tb(b, c, itemsize, per_buf_budget):
    """Batch-tile (sublane) size for a (B, C) score array."""
    assert b > 0
    # VMEM (and padded-HBM) footprint per row: C is lane-padded to a multiple of 128.
    bytes_per_row = _round_up(c, _LANE) * max(int(itemsize), 1)
    tb = max(per_buf_budget // bytes_per_row, _SUBLANE)
    tb = (tb // _SUBLANE) * _SUBLANE
    # Keep >= 2 grid blocks once the batch is non-trivial so both v7x TensorCores get
    # work from the "parallel" grid axis (harmless on single-TC v5e/v6e).
    tb = min(tb, _round_up(pl.cdiv(b, 2), _LANE))
    if tb >= b:
        return b                                       # full-extent block: always legal
    return max((tb // _SUBLANE) * _SUBLANE, _SUBLANE)


def _side_ce_sum(cos_raw, label_col, tb, batch, needs_mask, step):
    """Sum of per-example ArcFace CE losses for one (tb, C) block of one split."""
    cos = cos_raw.astype(jnp.float32)                  # (tb, C)
    c = cos.shape[1]

    # ArcFace margin restricted to the label column: a (tb, 1) column vector.
    cos_t = cos[:, label_col:label_col + 1]
    sin_t = jnp.sqrt(jnp.maximum(1.0 - cos_t * cos_t, 0.0))   # clamp: no NaN at |cos| ~ 1
    phi_t = cos_t * _COS_M - sin_t * _SIN_M
    phi_t = jnp.where(cos_t - _TH > 0.0, phi_t, cos_t - _MM)  # easy_margin=False branch

    if c == 2:
        # CE over the two logits [S*cos_other, S*phi_label] with the label as target:
        #   loss = softplus(S*(cos_other - phi_label))   (stable form; never overflows).
        other = 1 - label_col
        cos_o = cos[:, other:other + 1]
        z = _S * (cos_o - phi_t)
        per_ex = jnp.maximum(z, 0.0) + jnp.log(1.0 + jnp.exp(-jnp.abs(z)))
    else:
        # General C: correct the plain exp-sum for the label column instead of an
        # iota/where one-hot mix.  Assumes true cosines (logits bounded by S), so
        # exp(logit - S) never overflows and the running-max pass can be skipped.
        ex = jnp.exp(_S * cos - _S)                                     # (tb, C)
        sum_exp = (jnp.sum(ex, axis=1, keepdims=True)
                   - jnp.exp(_S * cos_t - _S) + jnp.exp(_S * phi_t - _S))
        per_ex = _S + jnp.log(sum_exp) - _S * phi_t                     # (tb, 1)

    if needs_mask:
        # Select (not multiply) so Inf/NaN from padded / overshoot rows cannot leak.
        row = step * tb + jax.lax.broadcasted_iota(jnp.int32, per_ex.shape, 0)
        per_ex = jnp.where(row < batch, per_ex, 0.0)

    return jnp.sum(per_ex, axis=0, keepdims=True)                       # (1, 1)


def _arcface_ce_kernel(pos_ref, neg_ref, psum_ref, *,
                       tb_pos, tb_neg, b_pos, b_neg, mask_pos, mask_neg):
    """One grid step: one block of positives (label=1) + one block of negatives (label=0)."""
    i = pl.program_id(0)
    s_pos = _side_ce_sum(pos_ref[...], 1, tb_pos, b_pos, mask_pos, i)
    s_neg = _side_ce_sum(neg_ref[...], 0, tb_neg, b_neg, mask_neg, i)
    total = s_pos + s_neg                                               # (1, 1)
    psum_ref[...] = jnp.broadcast_to(total.reshape(1, 1, 1), psum_ref.shape)


def arcface_loss(pos_score, neg_score):
    """JAX/Pallas equivalent of Arcfaceloss.forward(pos_score, neg_score)."""
    b_pos, b_neg = pos_score.shape[0], neg_score.shape[0]
    n_total = b_pos + b_neg
    if n_total == 0:
        return jnp.array(jnp.nan, dtype=jnp.float32)   # CE over an empty batch

    # An empty split is substituted by the other array and fully masked out (zero sum).
    pos_in = pos_score if b_pos > 0 else neg_score
    neg_in = neg_score if b_neg > 0 else pos_score
    c = pos_in.shape[1]
    assert neg_in.shape[1] == c and c >= 2, "Arcfaceloss needs at least 2 classes"

    per_buf, vmem_limit = _vmem_budgets()
    tb_pos = _pick_tb(pos_in.shape[0], c, pos_in.dtype.itemsize, per_buf)
    tb_neg = _pick_tb(neg_in.shape[0], c, neg_in.dtype.itemsize, per_buf)
    nb_pos = pl.cdiv(pos_in.shape[0], tb_pos)
    nb_neg = pl.cdiv(neg_in.shape[0], tb_neg)
    grid_n = max(nb_pos, nb_neg)

    # A side needs run-time masking unless its blocks cover exactly the valid rows on
    # every grid step (static decision -> zero cost in the clean, full-block case).
    mask_pos = not (b_pos > 0 and b_pos % tb_pos == 0 and b_pos // tb_pos == grid_n)
    mask_neg = not (b_neg > 0 and b_neg % tb_neg == 0 and b_neg // tb_neg == grid_n)

    def _idx(nb):
        if nb == grid_n:
            return lambda i: (i, 0)
        # Overshoot steps revisit the last block (no re-DMA) and are masked to zero.
        return lambda i: (jnp.minimum(i, nb - 1), 0)

    kernel = functools.partial(
        _arcface_ce_kernel,
        tb_pos=tb_pos, tb_neg=tb_neg, b_pos=b_pos, b_neg=b_neg,
        mask_pos=mask_pos, mask_neg=mask_neg)

    psums = pl.pallas_call(
        kernel,
        grid=(grid_n,),
        in_specs=[pl.BlockSpec((tb_pos, c), _idx(nb_pos)),
                  pl.BlockSpec((tb_neg, c), _idx(nb_neg))],
        out_specs=pl.BlockSpec((1, 1, _LANE), lambda i: (i, 0, 0)),
        out_shape=jax.ShapeDtypeStruct((grid_n, 1, _LANE), jnp.float32),
        compiler_params=pltpu.CompilerParams(
            dimension_semantics=("parallel",),       # independent partials -> both v7x TCs
            vmem_limit_bytes=vmem_limit),
    )(pos_in, neg_in)

    return jnp.sum(psums[:, 0, 0]) / float(n_total)


def _arcface_loss_ref(pos_score, neg_score):
    """Pure-JAX reference mirroring the PyTorch module, for sanity checking."""
    score = jnp.concatenate([pos_score, neg_score], axis=0).astype(jnp.float32)
    labels = jnp.concatenate(
        [jnp.ones((pos_score.shape[0],), jnp.int32),
         jnp.zeros((neg_score.shape[0],), jnp.int32)], axis=0)
    sine = jnp.sqrt(jnp.maximum(1.0 - score ** 2, 0.0))
    phi = score * _COS_M - sine * _SIN_M
    phi = jnp.where(score - _TH > 0, phi, score - _MM)
    onehot = jax.nn.one_hot(labels, score.shape[1], dtype=jnp.float32)
    out = _S * (onehot * phi + (1.0 - onehot) * score)
    logp = jax.nn.log_softmax(out, axis=1)
    return -jnp.mean(jnp.take_along_axis(logp, labels[:, None], axis=1))


if __name__ == "__main__":
    key = jax.random.PRNGKey(0)
    k1, k2, k3, k4, k5 = jax.random.split(key, 5)

    def _check(pos, neg, fn):
        got = fn(pos, neg)
        jax.block_until_ready(got)
        want = _arcface_loss_ref(pos, neg)
        assert jnp.allclose(got, want, rtol=1e-4, atol=1e-4), (got, want)

    # Canonical small case: 4 positive + 4 negative pairs, 2-class verification head.
    pos_small = jax.random.uniform(k1, (4, 2), jnp.float32, minval=-0.99, maxval=0.99)
    neg_small = jax.random.uniform(k2, (4, 2), jnp.float32, minval=-0.99, maxval=0.99)
    _check(pos_small, neg_small, jax.jit(arcface_loss))

    # Multi-block case: two batch tiles per side, padded tail rows masked.
    pos_med = jax.random.uniform(k3, (200, 2), jnp.float32, minval=-0.99, maxval=0.99)
    neg_med = jax.random.uniform(k4, (136, 2), jnp.float32, minval=-0.99, maxval=0.99)
    _check(pos_med, neg_med, arcface_loss)

    # Unequal block counts: the shorter side's index map clamps to its last block and
    # its overshoot grid steps contribute exactly zero.
    neg_short = jax.random.uniform(k5, (40, 2), jnp.float32, minval=-0.99, maxval=0.99)
    _check(pos_med, neg_short, arcface_loss)

    # Empty positive split: guarded, contributes nothing.
    pos_empty = jnp.zeros((0, 2), jnp.float32)
    _check(pos_empty, neg_short, arcface_loss)

    print("KERNEL_OK")
</pallas_src>

<mosaic_0001>
module attributes {stable_mosaic.version = 11 : i64} {
  func.func @_arcface_ce_kernel(%arg0: i32, %arg1: memref<4x2xf32, #tpu.memory_space<vmem>>, %arg2: memref<4x2xf32, #tpu.memory_space<vmem>>, %arg3: memref<1x1x128xf32, #tpu.memory_space<vmem>>) attributes {dimension_semantics = [#tpu.dimension_semantics<parallel>], iteration_bounds = array<i64: 1>, scalar_prefetch = 0 : i64, scratch_operands = 0 : i64, tpu.core_type = #tpu.core_type<tc>, window_params = [{transform_indices = @transform_0, window_bounds = array<i64: 4, 2>}, {transform_indices = @transform_1, window_bounds = array<i64: 4, 2>}, {transform_indices = @transform_2, window_bounds = array<i64: 1, 1, 128>}]} {
    %c0 = arith.constant 0 : index
    %c0_0 = arith.constant 0 : index
    %0 = vector.load %arg1[%c0, %c0_0] : memref<4x2xf32, #tpu.memory_space<vmem>>, vector<4x2xf32>
    %1 = vector.extract_strided_slice %0 {offsets = [0, 1], sizes = [4, 1], strides = [1, 1]} : vector<4x2xf32> to vector<4x1xf32>
    %2 = arith.mulf %1, %1 : vector<4x1xf32>
    %cst = arith.constant 1.000000e+00 : f32
    %3 = vector.broadcast %cst : f32 to vector<4x1xf32>
    %4 = arith.subf %3, %2 : vector<4x1xf32>
    %cst_1 = arith.constant 0.000000e+00 : f32
    %5 = vector.broadcast %cst_1 : f32 to vector<4x1xf32>
    %6 = arith.maximumf %4, %5 : vector<4x1xf32>
    %7 = math.sqrt %6 : vector<4x1xf32>
    %cst_2 = arith.constant 0.87758255 : f32
    %8 = vector.broadcast %cst_2 : f32 to vector<4x1xf32>
    %9 = arith.mulf %1, %8 : vector<4x1xf32>
    %cst_3 = arith.constant 0.47942555 : f32
    %10 = vector.broadcast %cst_3 : f32 to vector<4x1xf32>
    %11 = arith.mulf %7, %10 : vector<4x1xf32>
    %12 = arith.subf %9, %11 : vector<4x1xf32>
    %cst_4 = arith.constant -0.87758255 : f32
    %13 = vector.broadcast %cst_4 : f32 to vector<4x1xf32>
    %14 = arith.subf %1, %13 : vector<4x1xf32>
    %cst_5 = arith.constant 0.000000e+00 : f32
    %15 = vector.broadcast %cst_5 : f32 to vector<4x1xf32>
    %16 = arith.cmpf ogt, %14, %15 : vector<4x1xf32>
    %cst_6 = arith.constant 0.47942555 : f32
    %17 = vector.broadcast %cst_6 : f32 to vector<4x1xf32>
    %18 = arith.subf %1, %17 : vector<4x1xf32>
    %19 = arith.select %16, %12, %18 : vector<4x1xi1>, vector<4x1xf32>
    %20 = vector.extract_strided_slice %0 {offsets = [0, 0], sizes = [4, 1], strides = [1, 1]} : vector<4x2xf32> to vector<4x1xf32>
    %21 = arith.subf %20, %19 : vector<4x1xf32>
    %cst_7 = arith.constant 3.100000e+01 : f32
    %22 = vector.broadcast %cst_7 : f32 to vector<4x1xf32>
    %23 = arith.mulf %22, %21 : vector<4x1xf32>
    %cst_8 = arith.constant 0.000000e+00 : f32
    %24 = vector.broadcast %cst_8 : f32 to vector<4x1xf32>
    %25 = arith.maximumf %23, %24 : vector<4x1xf32>
    %26 = math.absf %23 : vector<4x1xf32>
    %cst_9 = arith.constant 0.000000e+00 : f32
    %27 = vector.broadcast %cst_9 : f32 to vector<4x1xf32>
    %28 = arith.subf %27, %26 : vector<4x1xf32>
    %29 = math.exp %28 : vector<4x1xf32>
    %cst_10 = arith.constant 1.000000e+00 : f32
    %30 = vector.broadcast %cst_10 : f32 to vector<4x1xf32>
    %31 = arith.addf %30, %29 : vector<4x1xf32>
    %32 = math.log %31 : vector<4x1xf32>
    %33 = arith.addf %25, %32 : vector<4x1xf32>
    %cst_11 = arith.constant dense<0.000000e+00> : vector<1xf32>
    %34 = vector.multi_reduction <add>, %33, %cst_11 [0] : vector<4x1xf32> to vector<1xf32>
    %35 = vector.shape_cast %34 : vector<1xf32> to vector<1x1xf32>
    %c0_12 = arith.constant 0 : index
    %c0_13 = arith.constant 0 : index
    %36 = vector.load %arg2[%c0_12, %c0_13] : memref<4x2xf32, #tpu.memory_space<vmem>>, vector<4x2xf32>
    %37 = vector.extract_strided_slice %36 {offsets = [0, 0], sizes = [4, 1], strides = [1, 1]} : vector<4x2xf32> to vector<4x1xf32>
    %38 = arith.mulf %37, %37 : vector<4x1xf32>
    %cst_14 = arith.constant 1.000000e+00 : f32
    %39 = vector.broadcast %cst_14 : f32 to vector<4x1xf32>
    %40 = arith.subf %39, %38 : vector<4x1xf32>
    %cst_15 = arith.constant 0.000000e+00 : f32
    %41 = vector.broadcast %cst_15 : f32 to vector<4x1xf32>
    %42 = arith.maximumf %40, %41 : vector<4x1xf32>
    %43 = math.sqrt %42 : vector<4x1xf32>
    %cst_16 = arith.constant 0.87758255 : f32
    %44 = vector.broadcast %cst_16 : f32 to vector<4x1xf32>
    %45 = arith.mulf %37, %44 : vector<4x1xf32>
    %cst_17 = arith.constant 0.47942555 : f32
    %46 = vector.broadcast %cst_17 : f32 to vector<4x1xf32>
    %47 = arith.mulf %43, %46 : vector<4x1xf32>
    %48 = arith.subf %45, %47 : vector<4x1xf32>
    %cst_18 = arith.constant -0.87758255 : f32
    %49 = vector.broadcast %cst_18 : f32 to vector<4x1xf32>
    %50 = arith.subf %37, %49 : vector<4x1xf32>
    %cst_19 = arith.constant 0.000000e+00 : f32
    %51 = vector.broadcast %cst_19 : f32 to vector<4x1xf32>
    %52 = arith.cmpf ogt, %50, %51 : vector<4x1xf32>
    %cst_20 = arith.constant 0.47942555 : f32
    %53 = vector.broadcast %cst_20 : f32 to vector<4x1xf32>
    %54 = arith.subf %37, %53 : vector<4x1xf32>
    %55 = arith.select %52, %48, %54 : vector<4x1xi1>, vector<4x1xf32>
    %56 = vector.extract_strided_slice %36 {offsets = [0, 1], sizes = [4, 1], strides = [1, 1]} : vector<4x2xf32> to vector<4x1xf32>
    %57 = arith.subf %56, %55 : vector<4x1xf32>
    %cst_21 = arith.constant 3.100000e+01 : f32
    %58 = vector.broadcast %cst_21 : f32 to vector<4x1xf32>
    %59 = arith.mulf %58, %57 : vector<4x1xf32>
    %cst_22 = arith.constant 0.000000e+00 : f32
    %60 = vector.broadcast %cst_22 : f32 to vector<4x1xf32>
    %61 = arith.maximumf %59, %60 : vector<4x1xf32>
    %62 = math.absf %59 : vector<4x1xf32>
    %cst_23 = arith.constant 0.000000e+00 : f32
    %63 = vector.broadcast %cst_23 : f32 to vector<4x1xf32>
    %64 = arith.subf %63, %62 : vector<4x1xf32>
    %65 = math.exp %64 : vector<4x1xf32>
    %cst_24 = arith.constant 1.000000e+00 : f32
    %66 = vector.broadcast %cst_24 : f32 to vector<4x1xf32>
    %67 = arith.addf %66, %65 : vector<4x1xf32>
    %68 = math.log %67 : vector<4x1xf32>
    %69 = arith.addf %61, %68 : vector<4x1xf32>
    %cst_25 = arith.constant dense<0.000000e+00> : vector<1xf32>
    %70 = vector.multi_reduction <add>, %69, %cst_25 [0] : vector<4x1xf32> to vector<1xf32>
    %71 = vector.shape_cast %70 : vector<1xf32> to vector<1x1xf32>
    %72 = arith.addf %35, %71 : vector<1x1xf32>
    %73 = vector.shape_cast %72 : vector<1x1xf32> to vector<1x1x1xf32>
    %74 = vector.shape_cast %73 : vector<1x1x1xf32> to vector<1x1x1xf32>
    %75 = vector.broadcast %74 : vector<1x1x1xf32> to vector<1x1x128xf32>
    %c0_26 = arith.constant 0 : index
    %c0_27 = arith.constant 0 : index
    %c0_28 = arith.constant 0 : index
    %76 = vector.load %arg3[%c0_26, %c0_27, %c0_28] : memref<1x1x128xf32, #tpu.memory_space<vmem>>, vector<1x1x128xf32>
    tpu.vector_store %arg3[%c0_26, %c0_27, %c0_28], %75 {strides = array<i32>} : memref<1x1x128xf32, #tpu.memory_space<vmem>>, vector<1x1x128xf32>,
    return
  }
  func.func @transform_0(%arg0: i32) -> (i32, i32) {
    %c0_i32 = arith.constant 0 : i32
    %c0_i32_0 = arith.constant 0 : i32
    return %arg0, %c0_i32 : i32, i32
  }
  func.func @transform_1(%arg0: i32) -> (i32, i32) {
    %c0_i32 = arith.constant 0 : i32
    %c0_i32_0 = arith.constant 0 : i32
    return %arg0, %c0_i32 : i32, i32
  }
  func.func @transform_2(%arg0: i32) -> (i32, i32, i32) {
    %c0_i32 = arith.constant 0 : i32
    %c0_i32_0 = arith.constant 0 : i32
    %c0_i32_1 = arith.constant 0 : i32
    return %arg0, %c0_i32, %c0_i32_0 : i32, i32, i32
  }
}

</mosaic_0001>

<bundles_post_ra>
// kernel: arcface_loss.1
= control target key start
LH: loop header
LB: loop body
LE: loop exit
PB: predicated region body
PF: predicated region fallthrough
CT: control target
= control target key end

     0   :  { %vm85_vm6 = vcmask 11272   ;;  %v131_v44 = vmov 0   ;;  %vm44_vm7 = vcmask 3072   ;;  %s164_s1 = inlined_call_operand.vmem [shape: f32[4,2], index: 1, kind: input, shape index: {}]   ;;  %s165_s0 = inlined_call_operand.vmem [shape: f32[4,2], index: 0, kind: input, shape index: {}]   ;;  %s166_s2 = inlined_call_operand.vmem [shape: f32[1,1,128], index: 2, kind: output, shape index: {}]  }
   0x1   :  { %v52_v0 = vld [vmem:[%s164_s1] sm:$0xf]  ;;  %s130_s1 = smov 127   ;;  %115 = vset.pattern.permute.xlu1 %v131_v44  ;;  %116 = vset.pattern.permute.xlu0 %v131_v44 }
   0x2   :  { %v153_v1 = vld [vmem:[%s165_s0] sm:$0xf]  ;;  %v53_v2 = vmul.f32 %v52_v0, %v52_v0  ;;  %v110_v13 = vadd.f32 0.87758255, %v52_v0  ;;  %v63_v16 = vmul.f32 0.87758255, %v52_v0 }
   0x3   :  { %v12_v3 = vmul.f32 %v153_v1, %v153_v1  ;;  %v22_v19 = vmul.f32 0.87758255, %v153_v1  ;;  %v108_v20 = vadd.f32 0.87758255, %v153_v1  ;;  %v111_v22 = vadd.f32 -0.47942555, %v52_v0 }
   0x4   :  { %v54_v4 = vsub.f32 1.0, %v53_v2  ;;  %vm67_vm4 = vcmp.gt.f32.partialorder %v110_v13, 0.0  ;;  %v109_v26 = vadd.f32 -0.47942555, %v153_v1  ;;  %s129_s0 = smov 1  }
   0x5   :  { %v13_v5 = vsub.f32 1.0, %v12_v3  ;;  %vm26_vm5 = vcmp.gt.f32.partialorder %v108_v20, 0.0 }
   0x6   :  { %v55_v6 = vmax.f32 %v54_v4, 0.0 }
   0x7   :  { %v14_v7 = vmax.f32 %v13_v5, 0.0 }
   0x8   :  { %117 = vrsqrt.f32 %v55_v6  ;;  %vm58_vm0 = vcmp.eq.f32.partialorder %v55_v6, inf  ;;  %v61_v9 = vand.u32 2147483648, %v55_v6  ;;  %vm60_vm1 = vcmp.eq.f32.partialorder %v55_v6, 0.0 }
   0x9   :  { %119 = vrsqrt.f32 %v14_v7  ;;  %vm17_vm2 = vcmp.eq.f32.partialorder %v14_v7, inf  ;;  %v20_v12 = vand.u32 2147483648, %v14_v7  ;;  %vm19_vm3 = vcmp.eq.f32.partialorder %v14_v7, 0.0 }
  0x15   :  { %v118_v8 = vpop.eup %117 }
  0x16   :  { %v120_v10 = vpop.eup %119  ;;  %v57_v11 = vmul.f32 %v118_v8, %v55_v6 }
  0x17   :  { %v16_v14 = vmul.f32 %v120_v10, %v14_v7 }
  0x18   :  { %v59_v15 = vsel %vm58_vm0, %v55_v6, %v57_v11 }
  0x19   :  { %v62_v17 = vsel %vm60_vm1, %v61_v9, %v59_v15  ;;  %v18_v18 = vsel %vm17_vm2, %v14_v7, %v16_v14 }
  0x1a   :  { %v64_v21 = vmul.f32 0.47942555, %v62_v17  ;;  %v21_v23 = vsel %vm19_vm3, %v20_v12, %v18_v18 }
  0x1b   :  { %v23_v24 = vmul.f32 0.47942555, %v21_v23 }
  0x1c   :  { %v65_v25 = vsub.f32 %v63_v16, %v64_v21 }
  0x1d   :  { %v24_v27 = vsub.f32 %v22_v19, %v23_v24 }
  0x1e   :  { %v69_v28 = vsel %vm67_vm4, %v65_v25, %v111_v22 }
  0x1f   :  { %71 = vrot.lane.b32.xlu0 %v69_v28, %s129_s0  ;;  %v28_v29 = vsel %vm26_vm5, %v24_v27, %v109_v26 }
  0x23   :  { %30 = vrot.lane.b32.xlu0 %v28_v29, %s130_s1 }
  0x91   :  { %v72_v30 = vpop.permute.xlu0 %71 }
  0x92   :  { %v74_v31 = vsub.f32 %v52_v0, %v72_v30 }
  0x94   :  { %v75_v32 = vmul.f32 31.0, %v74_v31 }
  0x95   :  { %v31_v50 = vpop.permute.xlu0 %30 }
  0x96   :  { %v77_v33 = vand.u32 2147483647, %v75_v32  ;;  %v76_v39 = vmax.f32 %v75_v32, 0.0  ;;  %v33_v51 = vsub.f32 %v153_v1, %v31_v50 }
  0x98   :  { %v78_v34 = vsub.f32 0.0, %v77_v33  ;;  %v34_v52 = vmul.f32 31.0, %v33_v51 }
  0x9a   :  { %v79_v35 = vmul.f32 1.442695, %v78_v34  ;;  %v36_v53 = vand.u32 2147483647, %v34_v52  ;;  %v35_v59 = vmax.f32 %v34_v52, 0.0 }
  0x9c   :  { %121 = vpow2.f32 %v79_v35  ;;  %v37_v54 = vsub.f32 0.0, %v36_v53 }
  0x9e   :  { %v38_v55 = vmul.f32 1.442695, %v37_v54 }
  0xa9   :  { %v122_v36 = vpop.eup %121 }
  0xaa   :  { %v81_v37 = vadd.f32 1.0, %v122_v36 }
  0xac   :  { %123 = vlog2.f32 %v81_v37 }
  0xad   :  { %125 = vpow2.f32 %v38_v55 }
  0xb9   :  { %v124_v38 = vpop.eup %123 }
  0xba   :  { %v83_v40 = vmul.f32 0.6931472, %v124_v38  ;;  %v126_v56 = vpop.eup %125 }
  0xbb   :  { %v40_v57 = vadd.f32 1.0, %v126_v56 }
  0xbc   :  { %v84_v41 = vadd.f32 %v83_v40, %v76_v39 }
  0xbd   :  { %127 = vlog2.f32 %v40_v57 }
  0xbe   :  { %v86_v42 = vsel %vm85_vm6, %v84_v41, 0.0 }
  0xbf   :  { %v87_v43 = vrot.slane %v86_v42, 4 }
  0xc1   :  { %v88_v45 = vadd.f32 %v87_v43, %v86_v42 }
  0xc3   :  { %v89_v46 = vrot.slane %v88_v45, 2 }
  0xc5   :  { %v90_v47 = vadd.f32 %v89_v46, %v88_v45 }
  0xc7   :  { %v91_v48 = vrot.slane %v90_v47, 1 }
  0xc9   :  { %v92_v49 = vadd.f32 %v91_v48, %v90_v47 }
  0xca   :  { %v128_v58 = vpop.eup %127 }
  0xcb   :  { %94 = vrot.lane.b32.xlu1 %v92_v49, %s130_s1  ;;  %v42_v60 = vmul.f32 0.6931472, %v128_v58 }
  0xcd   :  { %v43_v61 = vadd.f32 %v42_v60, %v35_v59 }
  0xcf   :  { %v45_v62 = vsel %vm44_vm7, %v43_v61, 0.0 }
  0xd0   :  { %v46_v63 = vrot.slane %v45_v62, 4 }
  0xd2   :  { %v47_v0 = vadd.f32 %v46_v63, %v45_v62 }
  0xd4   :  { %v48_v2 = vrot.slane %v47_v0, 2 }
  0xd6   :  { %v49_v3 = vadd.f32 %v48_v2, %v47_v0 }
  0xd8   :  { %v50_v4 = vrot.slane %v49_v3, 1 }
  0xda   :  { %v51_v1 = vadd.f32 %v50_v4, %v49_v3 }
 0x13d   :  { %v95_v5 = vpop.permute.xlu1 %94 }
 0x13e   :  { %v97_v6 = vadd.f32 %v95_v5, %v51_v1 }
 0x140   :  { %100 = vperm.xlu1 %115, %v97_v6  }
 0x1bb   :  { %v101_v7 = vpop.permute.xlu1 %100 }
 0x1bc   :  { %103 = vst [vmem:[%s166_s2] sm:$0x1] %v101_v7 }

</bundles_post_ra>
